<compile_context>
chip_gen: v7x
topology: tpu7x:2x2x1
jax: 0.10.0
libtpu: 0.0.40
codegen_flags: <defaults>
</compile_context>

<pallas_src>
import jax
import jax.numpy as jnp
from jax.experimental import pallas as pl
from jax.experimental.pallas import tpu as pltpu


def _pool_linear_kernel(feat_ref, w_ref, b_ref, out_ref):
    """Fused AdaptiveAvgPool2d((1,1)) + flatten + Linear for one batch tile.

      feat_ref: [TN, HW, C]   channels-last feature map (C -> lanes, HW -> sublanes)
      w_ref:    [C, OUT_PAD]  linear weight (in, out); 1/HW pre-folded; zero-padded
      b_ref:    [1, OUT_PAD]  bias, zero-padded to lane-dense width
      out_ref:  [TN, OUT_PAD] logits (padded lanes; sliced outside)
    """
    # Global sum-pool over the spatial (sublane) axis; f32 accumulation.
    pooled = jnp.sum(feat_ref[...].astype(jnp.float32), axis=1)        # [TN, C]
    # Single MXU matmul against the (scale-folded) weight, then bias add.
    acc = jnp.dot(pooled, w_ref[...], preferred_element_type=jnp.float32)
    out_ref[...] = (acc + b_ref[...]).astype(out_ref.dtype)


@jax.jit
def net_forward(x_nhwc, w, b):
    """Forward of `Net`'s avgpool + flatten + Linear tail.

    x_nhwc: [N, H, W, 2048] feature map from the ResNet backbone, channels-last
            (natural TPU conv layout; a PyTorch NCHW map only needs a transpose
            outside this function).
    w:      [2048, 80] -- Linear weight stored transposed (in, out) = weight.T.
    b:      [80]
    returns [N, 80] f32 logits.
    """
    N, H, W_, C = x_nhwc.shape
    HW = H * W_
    OUT = w.shape[1]
    out_pad = pl.cdiv(OUT, 128) * 128            # lane-dense output width (80 -> 128)

    itemsize = jnp.dtype(x_nhwc.dtype).itemsize

    # Batch tile: largest tile whose double-buffered feature block fits a
    # ~32 MiB budget, capped at 256 (v6e MXU rows); total request stays within
    # v7x's 64 MiB VMEM. Small N runs as a single full block; large N uses a
    # multiple-of-8 tile and lets the last block be a partial boundary block
    # (out-of-range output rows are dropped by the masked store).
    budget = 32 << 20
    tn_cap = max(8, min(256, budget // (2 * HW * C * itemsize)))
    if N <= tn_cap:
        tn = N
    else:
        tn = (tn_cap // 8) * 8
    grid = pl.cdiv(N, tn)

    # Pure reshape -- no transpose, no extra HBM traffic; C stays on lanes.
    feat = x_nhwc.reshape(N, HW, C)

    # Fold the 1/(H*W) average-pool scale into the padded weight (one-time op).
    w_p = jnp.pad(w.astype(jnp.float32), ((0, 0), (0, out_pad - OUT))) * (1.0 / HW)
    b_p = jnp.pad(b.astype(jnp.float32), (0, out_pad - OUT)).reshape(1, out_pad)

    # VMEM request from actual (double-buffered) buffer sizes + headroom,
    # clamped to 48 MiB so it is safe on v7x's 64 MiB per-core VMEM.
    feat_bytes = tn * HW * C * itemsize
    needed = 2 * feat_bytes + 2 * (C * out_pad * 4) + 2 * (tn * out_pad * 4)
    vmem_limit = int(min(48 << 20, max(16 << 20, needed + (8 << 20))))

    out = pl.pallas_call(
        _pool_linear_kernel,
        out_shape=jax.ShapeDtypeStruct((N, out_pad), jnp.float32),
        grid_spec=pltpu.PrefetchScalarGridSpec(
            num_scalar_prefetch=0,
            grid=(grid,),
            in_specs=[
                pl.BlockSpec((tn, HW, C), lambda i: (i, 0, 0)),
                pl.BlockSpec((C, out_pad), lambda i: (0, 0)),
                pl.BlockSpec((1, out_pad), lambda i: (0, 0)),
            ],
            out_specs=pl.BlockSpec((tn, out_pad), lambda i: (i, 0)),
        ),
        compiler_params=pltpu.CompilerParams(
            dimension_semantics=("parallel",),
            vmem_limit_bytes=vmem_limit),
    )(feat, w_p, b_p)

    return out[:, :OUT]


if __name__ == "__main__":
    key = jax.random.PRNGKey(0)
    k_x, k_w, k_b = jax.random.split(key, 3)

    N, H, W, C, OUT = 2, 4, 4, 2048, 80

    # TODO(synk): the external ResNet-50 conv backbone (model.children()[:-1]
    # minus its trailing AdaptiveAvgPool2d) is not reproduced here; the kernel
    # consumes its feature map directly, in channels-last (NHWC) layout.
    x = jax.random.normal(k_x, (N, H, W, C), dtype=jnp.float32)

    # Deterministic nn.Linear(2048, 80) init (PyTorch default:
    # U(-1/sqrt(in_features), 1/sqrt(in_features)) for both weight and bias).
    bound = 1.0 / float(C ** 0.5)
    w = jax.random.uniform(k_w, (C, OUT), dtype=jnp.float32,
                           minval=-bound, maxval=bound)
    b = jax.random.uniform(k_b, (OUT,), dtype=jnp.float32,
                           minval=-bound, maxval=bound)

    out = jax.block_until_ready(net_forward(x, w, b))

    # Pure-JAX reference: avgpool -> flatten -> linear.
    pooled_ref = jnp.mean(x, axis=(1, 2))   # [N, 2048]
    ref = pooled_ref @ w + b                # [N, 80]

    assert out.shape == (N, OUT)
    assert jnp.allclose(out, ref, atol=1e-4, rtol=1e-4), "mismatch vs reference"
    print("KERNEL_OK")
</pallas_src>

<mosaic_0001>
module attributes {stable_mosaic.version = 11 : i64} {
  func.func @_pool_linear_kernel(%arg0: i32, %arg1: memref<2x16x2048xf32, #tpu.memory_space<vmem>>, %arg2: memref<2048x128xf32, #tpu.memory_space<vmem>>, %arg3: memref<1x128xf32, #tpu.memory_space<vmem>>, %arg4: memref<2x128xf32, #tpu.memory_space<vmem>>) attributes {dimension_semantics = [#tpu.dimension_semantics<parallel>], iteration_bounds = array<i64: 1>, scalar_prefetch = 0 : i64, scratch_operands = 0 : i64, tpu.core_type = #tpu.core_type<tc>, window_params = [{transform_indices = @transform_0, window_bounds = array<i64: 2, 16, 2048>}, {pipeline_mode = #tpu.pipeline_mode<synchronous>, transform_indices = @transform_1, window_bounds = array<i64: 2048, 128>}, {pipeline_mode = #tpu.pipeline_mode<synchronous>, transform_indices = @transform_2, window_bounds = array<i64: 1, 128>}, {transform_indices = @transform_3, window_bounds = array<i64: 2, 128>}]} {
    %c0 = arith.constant 0 : index
    %c0_0 = arith.constant 0 : index
    %c0_1 = arith.constant 0 : index
    %0 = vector.load %arg1[%c0, %c0_0, %c0_1] : memref<2x16x2048xf32, #tpu.memory_space<vmem>>, vector<2x16x2048xf32>
    %cst = arith.constant dense<0.000000e+00> : vector<2x2048xf32>
    %1 = vector.multi_reduction <add>, %0, %cst [1] : vector<2x16x2048xf32> to vector<2x2048xf32>
    %c0_2 = arith.constant 0 : index
    %c0_3 = arith.constant 0 : index
    %2 = vector.load %arg2[%c0_2, %c0_3] : memref<2048x128xf32, #tpu.memory_space<vmem>>, vector<2048x128xf32>
    %cst_4 = arith.constant dense<0.000000e+00> : vector<2x128xf32>
    %3 = tpu.matmul %1, %2, %cst_4 {dimension_numbers = #tpu.dot_dimension_numbers<[1], [0], [0], [1], [0, 0, 1, 1], [], []>} : vector<2x2048xf32>, vector<2048x128xf32>, vector<2x128xf32> -> vector<2x128xf32>
    %c0_5 = arith.constant 0 : index
    %c0_6 = arith.constant 0 : index
    %4 = vector.load %arg3[%c0_5, %c0_6] : memref<1x128xf32, #tpu.memory_space<vmem>>, vector<1x128xf32>
    %5 = vector.broadcast %4 : vector<1x128xf32> to vector<2x128xf32>
    %6 = arith.addf %3, %5 : vector<2x128xf32>
    %c0_7 = arith.constant 0 : index
    %c0_8 = arith.constant 0 : index
    %7 = vector.load %arg4[%c0_7, %c0_8] : memref<2x128xf32, #tpu.memory_space<vmem>>, vector<2x128xf32>
    tpu.vector_store %arg4[%c0_7, %c0_8], %6 {strides = array<i32>} : memref<2x128xf32, #tpu.memory_space<vmem>>, vector<2x128xf32>,
    return
  }
  func.func @transform_0(%arg0: i32) -> (i32, i32, i32) {
    %c0_i32 = arith.constant 0 : i32
    %c0_i32_0 = arith.constant 0 : i32
    %c0_i32_1 = arith.constant 0 : i32
    return %arg0, %c0_i32, %c0_i32_0 : i32, i32, i32
  }
  func.func @transform_1(%arg0: i32) -> (i32, i32) {
    %c0_i32 = arith.constant 0 : i32
    %c0_i32_0 = arith.constant 0 : i32
    %c0_i32_1 = arith.constant 0 : i32
    return %c0_i32, %c0_i32_0 : i32, i32
  }
  func.func @transform_2(%arg0: i32) -> (i32, i32) {
    %c0_i32 = arith.constant 0 : i32
    %c0_i32_0 = arith.constant 0 : i32
    %c0_i32_1 = arith.constant 0 : i32
    return %c0_i32, %c0_i32_0 : i32, i32
  }
  func.func @transform_3(%arg0: i32) -> (i32, i32) {
    %c0_i32 = arith.constant 0 : i32
    %c0_i32_0 = arith.constant 0 : i32
    return %arg0, %c0_i32 : i32, i32
  }
}

</mosaic_0001>

<bundles_post_ra>
// kernel: net_forward.1
= control target key start
LH: loop header
LB: loop body
LE: loop exit
PB: predicated region body
PF: predicated region fallthrough
CT: control target
= control target key end

     0   :  { %vm598_vm0 = vcmask 1041409   ;;  %s3089_s0 = inlined_call_operand.vmem [shape: f32[2,16,2048], index: 0, kind: input, shape index: {}]   ;;  %s3090_s1 = inlined_call_operand.vmem [shape: f32[2048,128], index: 1, kind: input, shape index: {}]   ;;  %s3091_s2 = inlined_call_operand.vmem [shape: f32[1,128], index: 2, kind: input, shape index: {}]   ;;  %s3092_s3 = inlined_call_operand.hbm [shape: f32[2,128], index: 3, kind: output, shape index: {}]  }
   0x1   :  { %v319_v0 = vld [vmem:[%s3090_s1 + $0x80] sm:$0xff]  ;;  %v320_v1 = vld [vmem:[%s3090_s1 + $0x88] sm:$0xff]  ;;  %v321_v11 = vld [vmem:[%s3090_s1 + $0x90] sm:$0xff] }
   0x2   :  { %v303_v2 = vld [vmem:[%s3090_s1] sm:$0xff]  ;;  %v1487_v3 = vpack.c.bf16 %v320_v1, %v319_v0  ;;  %v304_v4 = vld [vmem:[%s3090_s1 + $0x8] sm:$0xff]  ;;  %v322_v13 = vld [vmem:[%s3090_s1 + $0x98] sm:$0xff] }
   0x3   :  { %v351_v5 = vld [vmem:[%s3090_s1 + $0x180] sm:$0xff]  ;;  %v352_v6 = vld [vmem:[%s3090_s1 + $0x188] sm:$0xff]  ;;  %v1489_v7 = vpack.c.bf16 %v304_v4, %v303_v2  ;;  %v305_v14 = vld [vmem:[%s3090_s1 + $0x10] sm:$0xff]  ;;  %v1491_v16 = vpack.c.bf16 %v322_v13, %v321_v11 }
   0x4   :  { %v1519_v8 = vpack.c.bf16 %v352_v6, %v351_v5  ;;  %v335_v9 = vld [vmem:[%s3090_s1 + $0x100] sm:$0xff]  ;;  %v336_v10 = vld [vmem:[%s3090_s1 + $0x108] sm:$0xff]  ;;  %1488 = vmatprep.subr.bf16.mxu0 %v1487_v3  ;;  %v306_v15 = vld [vmem:[%s3090_s1 + $0x18] sm:$0xff] }
   0x5   :  { %v1521_v12 = vpack.c.bf16 %v336_v10, %v335_v9  ;;  %1490 = vmatpush3.bf16.msra.mxu0 %v1489_v7  ;;  %v1493_v17 = vpack.c.bf16 %v306_v15, %v305_v14  ;;  %v353_v18 = vld [vmem:[%s3090_s1 + $0x190] sm:$0xff]  ;;  %v354_v19 = vld [vmem:[%s3090_s1 + $0x198] sm:$0xff]  ;;  %v323_v23 = vld [vmem:[%s3090_s1 + $0xa0] sm:$0xff] }
   0x6   :  { %1520 = vmatprep.subr.bf16.mxu1 %v1519_v8  ;;  %v337_v20 = vld [vmem:[%s3090_s1 + $0x110] sm:$0xff]  ;;  %v1523_v21 = vpack.c.bf16 %v354_v19, %v353_v18  ;;  %v338_v22 = vld [vmem:[%s3090_s1 + $0x118] sm:$0xff]  ;;  %v324_v24 = vld [vmem:[%s3090_s1 + $0xa8] sm:$0xff]  ;;  %1492 = vmatprep.subr.bf16.mxu0 %v1491_v16 }
   0x7   :  { %1522 = vmatpush3.bf16.msra.mxu1 %v1521_v12  ;;  %v1525_v25 = vpack.c.bf16 %v338_v22, %v337_v20  ;;  %v1495_v26 = vpack.c.bf16 %v324_v24, %v323_v23  ;;  %v307_v27 = vld [vmem:[%s3090_s1 + $0x20] sm:$0xff]  ;;  %v308_v28 = vld [vmem:[%s3090_s1 + $0x28] sm:$0xff]  ;;  %v325_v35 = vld [vmem:[%s3090_s1 + $0xb0] sm:$0xff] }
   0x8   :  { %v355_v29 = vld [vmem:[%s3090_s1 + $0x1a0] sm:$0xff]  ;;  %1524 = vmatprep.subr.bf16.mxu1 %v1523_v21  ;;  %v356_v30 = vld [vmem:[%s3090_s1 + $0x1a8] sm:$0xff]  ;;  %v1497_v33 = vpack.c.bf16 %v308_v28, %v307_v27  ;;  %v326_v36 = vld [vmem:[%s3090_s1 + $0xb8] sm:$0xff] }
   0x9   :  { %v339_v31 = vld [vmem:[%s3090_s1 + $0x120] sm:$0xff]  ;;  %v340_v32 = vld [vmem:[%s3090_s1 + $0x128] sm:$0xff]  ;;  %1494 = vmatpush3.bf16.msra.mxu0 %v1493_v17  ;;  %v1527_v34 = vpack.c.bf16 %v356_v30, %v355_v29  ;;  %v309_v37 = vld [vmem:[%s3090_s1 + $0x30] sm:$0xff]  ;;  %v1499_v39 = vpack.c.bf16 %v326_v36, %v325_v35 }
   0xa   :  { %1496 = vmatprep.subr.bf16.mxu0 %v1495_v26  ;;  %v1529_v38 = vpack.c.bf16 %v340_v32, %v339_v31  ;;  %v310_v40 = vld [vmem:[%s3090_s1 + $0x38] sm:$0xff]  ;;  %v357_v41 = vld [vmem:[%s3090_s1 + $0x1b0] sm:$0xff]  ;;  %v327_v46 = vld [vmem:[%s3090_s1 + $0xc0] sm:$0xff] }
   0xb   :  { %1526 = vmatpush3.bf16.msra.mxu1 %v1525_v25  ;;  %v358_v42 = vld [vmem:[%s3090_s1 + $0x1b8] sm:$0xff]  ;;  %v341_v44 = vld [vmem:[%s3090_s1 + $0x130] sm:$0xff]  ;;  %v328_v47 = vld [vmem:[%s3090_s1 + $0xc8] sm:$0xff]  ;;  %v1501_v48 = vpack.c.bf16 %v310_v40, %v309_v37 }
   0xc   :  { %1528 = vmatprep.subr.bf16.mxu1 %v1527_v34  ;;  %v1531_v43 = vpack.c.bf16 %v358_v42, %v357_v41  ;;  %v342_v45 = vld [vmem:[%s3090_s1 + $0x138] sm:$0xff]  ;;  %v359_v49 = vld [vmem:[%s3090_s1 + $0x1c0] sm:$0xff]  ;;  %v360_v50 = vld [vmem:[%s3090_s1 + $0x1c8] sm:$0xff]  ;;  %v1503_v52 = vpack.c.bf16 %v328_v47, %v327_v46 }
   0xd   :  { %1498 = vmatpush3.bf16.msra.mxu0 %v1497_v33  ;;  %v1533_v51 = vpack.c.bf16 %v342_v45, %v341_v44  ;;  %v311_v53 = vld [vmem:[%s3090_s1 + $0x40] sm:$0xff]  ;;  %v312_v54 = vld [vmem:[%s3090_s1 + $0x48] sm:$0xff]  ;;  %v1535_v56 = vpack.c.bf16 %v360_v50, %v359_v49  ;;  %v329_v58 = vld [vmem:[%s3090_s1 + $0xd0] sm:$0xff] }
   0xe   :  { %1500 = vmatprep.subr.bf16.mxu0 %v1499_v39  ;;  %v343_v55 = vld [vmem:[%s3090_s1 + $0x140] sm:$0xff]  ;;  %v344_v57 = vld [vmem:[%s3090_s1 + $0x148] sm:$0xff]  ;;  %v330_v59 = vld [vmem:[%s3090_s1 + $0xd8] sm:$0xff]  ;;  %v1505_v62 = vpack.c.bf16 %v312_v54, %v311_v53 }
   0xf   :  { %1530 = vmatpush3.bf16.msra.mxu1 %v1529_v38  ;;  %v361_v60 = vld [vmem:[%s3090_s1 + $0x1d0] sm:$0xff]  ;;  %v362_v61 = vld [vmem:[%s3090_s1 + $0x1d8] sm:$0xff]  ;;  %v1537_v2 = vpack.c.bf16 %v344_v57, %v343_v55  ;;  %v1507_v3 = vpack.c.bf16 %v330_v59, %v329_v58  ;;  %v331_v5 = vld [vmem:[%s3090_s1 + $0xe0] sm:$0xff] }
  0x10   :  { %1532 = vmatprep.subr.bf16.mxu1 %v1531_v43  ;;  %v313_v63 = vld [vmem:[%s3090_s1 + $0x50] sm:$0xff]  ;;  %v314_v0 = vld [vmem:[%s3090_s1 + $0x58] sm:$0xff]  ;;  %v332_v6 = vld [vmem:[%s3090_s1 + $0xe8] sm:$0xff]  ;;  %v1539_v7 = vpack.c.bf16 %v362_v61, %v361_v60 }
  0x11   :  { %1502 = vmatpush3.bf16.msra.mxu0 %v1501_v48  ;;  %v345_v1 = vld [vmem:[%s3090_s1 + $0x150] sm:$0xff]  ;;  %v346_v4 = vld [vmem:[%s3090_s1 + $0x158] sm:$0xff]  ;;  %v1942_v8 = vld [vmem:[%s3090_s1 + $0x60] sm:$0xff]  ;;  %v1509_v14 = vpack.c.bf16 %v314_v0, %v313_v63  ;;  %v1511_v21 = vpack.c.bf16 %v332_v6, %v331_v5 }
  0x12   :  { %1504 = vmatprep.subr.bf16.mxu0 %v1503_v52  ;;  %v1947_v9 = vld [vmem:[%s3090_s1 + $0x68] sm:$0xff]  ;;  %v363_v10 = vld [vmem:[%s3090_s1 + $0x1e0] sm:$0xff]  ;;  %v1968_v15 = vld [vmem:[%s3090_s1 + $0xf0] sm:$0xff]  ;;  %v1541_v20 = vpack.c.bf16 %v346_v4, %v345_v1 }
  0x13   :  { %1534 = vmatpush3.bf16.msra.mxu1 %v1533_v51  ;;  %v364_v11 = vld [vmem:[%s3090_s1 + $0x1e8] sm:$0xff]  ;;  %v1958_v12 = vld [vmem:[%s3090_s1 + $0x160] sm:$0xff]  ;;  %v1973_v16 = vld [vmem:[%s3090_s1 + $0xf8] sm:$0xff]  ;;  %v1513_v32 = vpack.c.bf16 %v1947_v9, %v1942_v8 }
  0x14   :  { %1536 = vmatprep.subr.bf16.mxu1 %v1535_v56  ;;  %v1963_v13 = vld [vmem:[%s3090_s1 + $0x168] sm:$0xff]  ;;  %v1978_v17 = vld [vmem:[%s3090_s1 + $0x70] sm:$0xff]  ;;  %v1983_v18 = vld [vmem:[%s3090_s1 + $0x78] sm:$0xff]  ;;  %v1543_v25 = vpack.c.bf16 %v364_v11, %v363_v10  ;;  %v1515_v44 = vpack.c.bf16 %v1973_v16, %v1968_v15 }
  0x15   :  { %1506 = vmatpush3.bf16.msra.mxu0 %v1505_v62  ;;  %v1988_v19 = vld [vmem:[%s3090_s1 + $0x1f0] sm:$0xff]  ;;  %v366_v22 = vld [vmem:[%s3090_s1 + $0x1f8] sm:$0xff]  ;;  %v16_v23 = vld [vmem:[%s3089_s0 + $0x8] sm:$0xff]  ;;  %v1545_v37 = vpack.c.bf16 %v1963_v13, %v1958_v12  ;;  %v1517_v45 = vpack.c.bf16 %v1983_v18, %v1978_v17 }
  0x16   :  { %1508 = vmatprep.subr.bf16.mxu0 %v1507_v3  ;;  %v32_v24 = vld [vmem:[%s3089_s0 + $0x88] sm:$0xff]  ;;  %v2002_v26 = vld [vmem:[%s3090_s1 + $0x170] sm:$0xff]  ;;  %v2007_v27 = vld [vmem:[%s3090_s1 + $0x178] sm:$0xff]  ;;  %v1547_v46 = vpack.c.bf16 %v366_v22, %v1988_v19 }
  0x17   :  { %1538 = vmatpush3.bf16.msra.mxu1 %v1537_v2  ;;  %v48_v28 = vld [vmem:[%s3089_s0 + $0x108] sm:$0xff]  ;;  %v86_v30 = vadd.f32 %v32_v24, %v16_v23  ;;  %v15_v31 = vld [vmem:[%s3089_s0] sm:$0xff]  ;;  %v18_v43 = vld [vmem:[%s3089_s0 + $0x18] sm:$0xff]  ;;  %v1549_v56 = vpack.c.bf16 %v2007_v27, %v2002_v26 }
  0x18   :  { %1540 = vmatprep.subr.bf16.mxu1 %v1539_v7  ;;  %v64_v29 = vld [vmem:[%s3089_s0 + $0x188] sm:$0xff]  ;;  %v31_v34 = vld [vmem:[%s3089_s0 + $0x80] sm:$0xff]  ;;  %v34_v48 = vld [vmem:[%s3089_s0 + $0x98] sm:$0xff] }
  0x19   :  { %v198_v33 = vadd.f32 %v64_v29, %v48_v28  ;;  %v47_v35 = vld [vmem:[%s3089_s0 + $0x100] sm:$0xff]  ;;  %1510 = vmatpush3.bf16.msra.mxu0 %v1509_v14  ;;  %v87_v38 = vrot.slane %v86_v30, 4  ;;  %v79_v39 = vadd.f32 %v31_v34, %v15_v31  ;;  %v384_v42 = vld [vmem:[%s3090_s1 + $0x288] sm:$0xff]  ;;  %v50_v49 = vld [vmem:[%s3089_s0 + $0x118] sm:$0xff]  ;;  %v100_v54 = vadd.f32 %v34_v48, %v18_v43 }
  0x1a   :  { %v63_v36 = vld [vmem:[%s3089_s0 + $0x180] sm:$0xff]  ;;  %1512 = vmatprep.subr.bf16.mxu0 %v1511_v21  ;;  %v66_v50 = vld [vmem:[%s3089_s0 + $0x198] sm:$0xff]  ;;  %v416_v60 = vld [vmem:[%s3090_s1 + $0x388] sm:$0xff] }
  0x1b   :  { %v191_v40 = vadd.f32 %v63_v36, %v47_v35  ;;  %v383_v41 = vld [vmem:[%s3090_s1 + $0x280] sm:$0xff]  ;;  %1542 = vmatpush3.bf16.msra.mxu1 %v1541_v20  ;;  %v199_v47 = vrot.slane %v198_v33, 4  ;;  %v88_v51 = vadd.f32 %v87_v38, %v86_v30  ;;  %v80_v52 = vrot.slane %v79_v39, 4  ;;  %v17_v61 = vld [vmem:[%s3089_s0 + $0x10] sm:$0xff]  ;;  %v368_v24 = vld [vmem:[%s3090_s1 + $0x208] sm:$0xff] }
  0x1c   :  { %1544 = vmatprep.subr.bf16.mxu1 %v1543_v25  ;;  %v415_v55 = vld [vmem:[%s3090_s1 + $0x380] sm:$0xff]  ;;  %v1551_v58 = vpack.c.bf16 %v384_v42, %v383_v41  ;;  %v212_v59 = vadd.f32 %v66_v50, %v50_v49  ;;  %v33_v62 = vld [vmem:[%s3089_s0 + $0x90] sm:$0xff]  ;;  %v101_v2 = vrot.slane %v100_v54, 4  ;;  %v386_v36 = vld [vmem:[%s3090_s1 + $0x298] sm:$0xff] }
  0x1d   :  { %v192_v53 = vrot.slane %v191_v40, 4  ;;  %v200_v57 = vadd.f32 %v199_v47, %v198_v33  ;;  %1514 = vmatpush3.bf16.msra.mxu0 %v1513_v32  ;;  %v89_v63 = vrot.slane %v88_v51, 2  ;;  %v81_v0 = vadd.f32 %v80_v52, %v79_v39  ;;  %v49_v3 = vld [vmem:[%s3089_s0 + $0x110] sm:$0xff]  ;;  %v367_v23 = vld [vmem:[%s3090_s1 + $0x200] sm:$0xff] }
  0x1e   :  { %v65_v4 = vld [vmem:[%s3089_s0 + $0x190] sm:$0xff]  ;;  %1516 = vmatprep.subr.bf16.mxu0 %v1515_v44  ;;  %v213_v6 = vrot.slane %v212_v59, 4  ;;  %v1583_v7 = vpack.c.bf16 %v416_v60, %v415_v55  ;;  %v93_v8 = vadd.f32 %v33_v62, %v17_v61  ;;  %v102_v12 = vadd.f32 %v101_v2, %v100_v54  ;;  %v387_v50 = vld [vmem:[%s3090_s1 + $0x2a0] sm:$0xff] }
  0x1f   :  { %v193_v1 = vadd.f32 %v192_v53, %v191_v40  ;;  %1546 = vmatpush3.bf16.msra.mxu1 %v1545_v37  ;;  %v201_v5 = vrot.slane %v200_v57, 2  ;;  %v90_v9 = vadd.f32 %v89_v63, %v88_v51  ;;  %v82_v10 = vrot.slane %v81_v0, 2  ;;  %v385_v35 = vld [vmem:[%s3090_s1 + $0x290] sm:$0xff]  ;;  %v388_v51 = vld [vmem:[%s3090_s1 + $0x2a8] sm:$0xff]  ;;  %v399_v55 = vld [vmem:[%s3090_s1 + $0x300] sm:$0xff] }
  0x20   :  { %1548 = vmatprep.subr.bf16.mxu1 %v1547_v46  ;;  %v214_v14 = vadd.f32 %v213_v6, %v212_v59  ;;  %v94_v15 = vrot.slane %v93_v8, 4  ;;  %v205_v16 = vadd.f32 %v65_v4, %v49_v3  ;;  %v103_v20 = vrot.slane %v102_v12, 2  ;;  %v370_v46 = vld [vmem:[%s3090_s1 + $0x218] sm:$0xff]  ;;  %v389_v2 = vld [vmem:[%s3090_s1 + $0x2b0] sm:$0xff]  ;;  %v2140_v6 = vld [vmem:[%s3090_s1 + $0x3a8] sm:$0xff] }
  0x21   :  { %v194_v11 = vrot.slane %v193_v1, 2  ;;  %v202_v13 = vadd.f32 %v201_v5, %v200_v57  ;;  %1518 = vmatpush3.bf16.msra.mxu0 %v1517_v45  ;;  %v91_v17 = vrot.slane %v90_v9, 1  ;;  %v83_v18 = vadd.f32 %v82_v10, %v81_v0  ;;  %v369_v45 = vld [vmem:[%s3090_s1 + $0x210] sm:$0xff]  ;;  %v418_v59 = vld [vmem:[%s3090_s1 + $0x398] sm:$0xff]  ;;  %v371_v0 = vld [vmem:[%s3090_s1 + $0x220] sm:$0xff] }
  0x22   :  { %1552 = vmatprep.subr.bf16.mxu0 %v1551_v58  ;;  %v215_v22 = vrot.slane %v214_v14, 2  ;;  %v95_v25 = vadd.f32 %v94_v15, %v93_v8  ;;  %v206_v26 = vrot.slane %v205_v16, 4  ;;  %v104_v30 = vadd.f32 %v103_v20, %v102_v12  ;;  %v417_v58 = vld [vmem:[%s3090_s1 + $0x390] sm:$0xff]  ;;  %v2130_v4 = vld [vmem:[%s3090_s1 + $0x318] sm:$0xff]  ;;  %v2135_v5 = vld [vmem:[%s3090_s1 + $0x3a0] sm:$0xff] }
  0x23   :  { %v195_v19 = vadd.f32 %v194_v11, %v193_v1  ;;  %1550 = vmatpush3.bf16.msra.mxu1 %v1549_v56  ;;  %v203_v21 = vrot.slane %v202_v13, 1  ;;  %v92_v27 = vadd.f32 %v91_v17, %v90_v9  ;;  %v84_v28 = vrot.slane %v83_v18, 1  ;;  %v400_v56 = vld [vmem:[%s3090_s1 + $0x308] sm:$0xff]  ;;  %v2125_v3 = vld [vmem:[%s3090_s1 + $0x310] sm:$0xff]  ;;  %v390_v9 = vld [vmem:[%s3090_s1 + $0x2b8] sm:$0xff] }
  0x24   :  { %1584 = vmatprep.subr.bf16.mxu1 %v1583_v7  ;;  %v216_v32 = vadd.f32 %v215_v22, %v214_v14  ;;  %v96_v33 = vrot.slane %v95_v25, 2  ;;  %v207_v34 = vadd.f32 %v206_v26, %v205_v16  ;;  %v105_v39 = vrot.slane %v104_v30, 1  ;;  %v372_v1 = vld [vmem:[%s3090_s1 + $0x228] sm:$0xff]  ;;  %v2145_v7 = vld [vmem:[%s3090_s1 + $0x320] sm:$0xff]  ;;  %v2158_v10 = vld [vmem:[%s3090_s1 + $0x230] sm:$0xff] }
  0x25   :  { %v196_v29 = vrot.slane %v195_v19, 1  ;;  %v204_v31 = vadd.f32 %v203_v21, %v202_v13  ;;  %v85_v37 = vadd.f32 %v84_v28, %v83_v18  ;;  %v1553_v40 = vpack.c.bf16 %v368_v24, %v367_v23  ;;  %v2150_v8 = vld [vmem:[%s3090_s1 + $0x328] sm:$0xff]  ;;  %v2163_v11 = vld [vmem:[%s3090_s1 + $0x238] sm:$0xff]  ;;  %v2168_v14 = vld [vmem:[%s3090_s1 + $0x3b0] sm:$0xff] }
  0x26   :  { %v217_v42 = vrot.slane %v216_v32, 1  ;;  %v97_v43 = vadd.f32 %v96_v33, %v95_v25  ;;  %v208_v44 = vrot.slane %v207_v34, 2  ;;  %v106_v48 = vadd.f32 %v105_v39, %v104_v30  ;;  %v2173_v15 = vld [vmem:[%s3090_s1 + $0x3b8] sm:$0xff]  ;;  %v2178_v16 = vld [vmem:[%s3090_s1 + $0x330] sm:$0xff]  ;;  %v2188_v18 = vld [vmem:[%s3090_s1 + $0x2c0] sm:$0xff] }
  0x27   :  { %v197_v38 = vadd.f32 %v196_v29, %v195_v19  ;;  %v600_v41 = vsel %vm598_vm0, %v204_v31, %v92_v27  ;;  %v1555_v49 = vpack.c.bf16 %v386_v36, %v385_v35  ;;  %v1557_v57 = vpack.c.bf16 %v370_v46, %v369_v45  ;;  %v2183_v17 = vld [vmem:[%s3090_s1 + $0x338] sm:$0xff]  ;;  %v2193_v19 = vld [vmem:[%s3090_s1 + $0x2c8] sm:$0xff]  ;;  %v2198_v22 = vld [vmem:[%s3090_s1 + $0x240] sm:$0xff] }
  0x28   :  { %695 = vmatprep.mubr.f32.mxu0 %v600_v41  ;;  %v218_v52 = vadd.f32 %v217_v42, %v216_v32  ;;  %v98_v53 = vrot.slane %v97_v43, 1  ;;  %v209_v54 = vadd.f32 %v208_v44, %v207_v34  ;;  %v1559_v63 = vpack.c.bf16 %v388_v51, %v387_v50  ;;  %v2203_v23 = vld [vmem:[%s3090_s1 + $0x248] sm:$0xff]  ;;  %v2208_v24 = vld [vmem:[%s3090_s1 + $0x3c0] sm:$0xff]  ;;  %v2229_v30 = vld [vmem:[%s3090_s1 + $0x2d0] sm:$0xff] }
  0x29   :  { %v599_v47 = vsel %vm598_vm0, %v197_v38, %v85_v37  ;;  %v1585_v13 = vpack.c.bf16 %v400_v56, %v399_v55  ;;  %v1587_v20 = vpack.c.bf16 %v418_v59, %v417_v58  ;;  %v1561_v21 = vpack.c.bf16 %v372_v1, %v371_v0  ;;  %v2213_v25 = vld [vmem:[%s3090_s1 + $0x3c8] sm:$0xff]  ;;  %v2218_v26 = vld [vmem:[%s3090_s1 + $0x340] sm:$0xff]  ;;  %v2234_v31 = vld [vmem:[%s3090_s1 + $0x2d8] sm:$0xff] }
  0x2a   :  { %696 = vmatmul.mubr.f32.vlgmr.msra.gmra.mrb[0].mxu0 %v599_v47  ;;  %v602_v60 = vsel %vm598_vm0, %v218_v52, %v106_v48  ;;  %v99_v61 = vadd.f32 %v98_v53, %v97_v43  ;;  %v210_v62 = vrot.slane %v209_v54, 1  ;;  %v2223_v27 = vld [vmem:[%s3090_s1 + $0x348] sm:$0xff]  ;;  %v1563_v29 = vpack.c.bf16 %v390_v9, %v389_v2  ;;  %v2239_v32 = vld [vmem:[%s3090_s1 + $0x250] sm:$0xff]  ;;  %v2244_v33 = vld [vmem:[%s3090_s1 + $0x258] sm:$0xff] }
  0x2b   :  { %1554 = vmatpush3.bf16.msra.mxu0 %v1553_v40  ;;  %765 = vmatprep.mubr.f32.mxu1 %v602_v60  ;;  %v2249_v34 = vld [vmem:[%s3090_s1 + $0x3d0] sm:$0xff]  ;;  %v2254_v35 = vld [vmem:[%s3090_s1 + $0x3d8] sm:$0xff]  ;;  %v1589_v37 = vpack.c.bf16 %v2130_v4, %v2125_v3  ;;  %v1591_v38 = vpack.c.bf16 %v2140_v6, %v2135_v5  ;;  %v1593_v39 = vpack.c.bf16 %v2150_v8, %v2145_v7  ;;  %v2277_v42 = vld [vmem:[%s3090_s1 + $0x2e0] sm:$0xff] }
  0x2c   :  { %1556 = vmatprep.subr.bf16.mxu0 %v1555_v49  ;;  %v211_v12 = vadd.f32 %v210_v62, %v209_v54  ;;  %v2259_v36 = vld [vmem:[%s3090_s1 + $0x350] sm:$0xff]  ;;  %v1565_v40 = vpack.c.bf16 %v2163_v11, %v2158_v10  ;;  %v2272_v41 = vld [vmem:[%s3090_s1 + $0x358] sm:$0xff]  ;;  %v2282_v43 = vld [vmem:[%s3090_s1 + $0x2e8] sm:$0xff]  ;;  %v1595_v44 = vpack.c.bf16 %v2173_v15, %v2168_v14  ;;  %v1597_v45 = vpack.c.bf16 %v2183_v17, %v2178_v16 }
  0x2d   :  { %v1567_v46 = vpack.c.bf16 %v2193_v19, %v2188_v18  ;;  %v2293_v47 = vld [vmem:[%s3090_s1 + $0x260] sm:$0xff]  ;;  %v2298_v48 = vld [vmem:[%s3090_s1 + $0x268] sm:$0xff]  ;;  %v1569_v52 = vpack.c.bf16 %v2203_v23, %v2198_v22  ;;  %v1599_v53 = vpack.c.bf16 %v2213_v25, %v2208_v24  ;;  %v1601_v54 = vpack.c.bf16 %v2223_v27, %v2218_v26  ;;  %v2351_v5 = vld [vmem:[%s3090_s1 + $0x2f0] sm:$0xff] }
  0x2e   :  { %v601_v28 = vsel %vm598_vm0, %v211_v12, %v99_v61  ;;  %v20_v49 = vld [vmem:[%s3089_s0 + $0x28] sm:$0xff]  ;;  %v2318_v55 = vld [vmem:[%s3090_s1 + $0x3e0] sm:$0xff]  ;;  %v1571_v60 = vpack.c.bf16 %v2234_v31, %v2229_v30  ;;  %v1573_v61 = vpack.c.bf16 %v2244_v33, %v2239_v32  ;;  %v1603_v3 = vpack.c.bf16 %v2254_v35, %v2249_v34  ;;  %v22_v8 = vld [vmem:[%s3089_s0 + $0x38] sm:$0xff] }
  0x2f   :  { %1558 = vmatpush3.bf16.msra.mxu0 %v1557_v57  ;;  %766 = vmatmul.mubr.f32.vlgmr.msra.gmra.mrb[0].mxu1 %v601_v28  ;;  %v36_v50 = vld [vmem:[%s3089_s0 + $0xa8] sm:$0xff]  ;;  %v19_v58 = vld [vmem:[%s3089_s0 + $0x20] sm:$0xff]  ;;  %v1605_v4 = vpack.c.bf16 %v2272_v41, %v2259_v36  ;;  %v38_v9 = vld [vmem:[%s3089_s0 + $0xb8] sm:$0xff]  ;;  %v1575_v10 = vpack.c.bf16 %v2282_v43, %v2277_v42  ;;  %v1577_v19 = vpack.c.bf16 %v2298_v48, %v2293_v47 }
  0x30   :  { %1560 = vmatprep.subr.bf16.mxu0 %v1559_v63  ;;  %1586 = vmatpush3.bf16.msra.mxu1 %v1585_v13  ;;  %v52_v51 = vld [vmem:[%s3089_s0 + $0x128] sm:$0xff]  ;;  %v114_v57 = vadd.f32 %v36_v50, %v20_v49  ;;  %v35_v59 = vld [vmem:[%s3089_s0 + $0xa0] sm:$0xff]  ;;  %v2364_v11 = vld [vmem:[%s3090_s1 + $0x2f8] sm:$0xff]  ;;  %v128_v18 = vadd.f32 %v38_v9, %v22_v8 }
  0x31   :  { %1588 = vmatprep.subr.bf16.mxu1 %v1587_v20  ;;  %v68_v56 = vld [vmem:[%s3089_s0 + $0x1a8] sm:$0xff]  ;;  %v51_v0 = vld [vmem:[%s3089_s0 + $0x120] sm:$0xff]  ;;  %v107_v2 = vadd.f32 %v35_v59, %v19_v58  ;;  %v54_v14 = vld [vmem:[%s3089_s0 + $0x138] sm:$0xff] }
  0x32   :  { %v2336_v62 = vld [vmem:[%s3090_s1 + $0x3e8] sm:$0xff]  ;;  %v226_v63 = vadd.f32 %v68_v56, %v52_v51  ;;  %v67_v1 = vld [vmem:[%s3089_s0 + $0x1a0] sm:$0xff]  ;;  %v115_v6 = vrot.slane %v114_v57, 4  ;;  %v70_v15 = vld [vmem:[%s3089_s0 + $0x1b8] sm:$0xff]  ;;  %v129_v30 = vrot.slane %v128_v18, 4 }
  0x33   :  { %1562 = vmatpush3.bf16.msra.mxu0 %v1561_v21  ;;  %v219_v7 = vadd.f32 %v67_v1, %v51_v0  ;;  %v108_v13 = vrot.slane %v107_v2, 4  ;;  %v240_v22 = vadd.f32 %v70_v15, %v54_v14  ;;  %v1607_v23 = vpack.c.bf16 %v2336_v62, %v2318_v55  ;;  %v21_v31 = vld [vmem:[%s3089_s0 + $0x30] sm:$0xff]  ;;  %v447_v24 = vld [vmem:[%s3090_s1 + $0x480] sm:$0xff]  ;;  %v448_v25 = vld [vmem:[%s3090_s1 + $0x488] sm:$0xff] }
  0x34   :  { %1564 = vmatprep.subr.bf16.mxu0 %v1563_v29  ;;  %1590 = vmatpush3.bf16.msra.mxu1 %v1589_v37  ;;  %v227_v12 = vrot.slane %v226_v63, 4  ;;  %v116_v20 = vadd.f32 %v115_v6, %v114_v57  ;;  %v37_v37 = vld [vmem:[%s3089_s0 + $0xb0] sm:$0xff]  ;;  %v130_v50 = vadd.f32 %v129_v30, %v128_v18  ;;  %v411_v18 = vld [vmem:[%s3090_s1 + $0x360] sm:$0xff]  ;;  %v430_v34 = vld [vmem:[%s3090_s1 + $0x3f8] sm:$0xff]  ;;  %v1615_v35 = vpack.c.bf16 %v448_v25, %v447_v24 }
  0x35   :  { %1592 = vmatprep.subr.bf16.mxu1 %v1591_v38  ;;  %v220_v21 = vrot.slane %v219_v7, 4  ;;  %v109_v29 = vadd.f32 %v108_v13, %v107_v2  ;;  %v53_v38 = vld [vmem:[%s3089_s0 + $0x130] sm:$0xff]  ;;  %v121_v51 = vadd.f32 %v37_v37, %v21_v31  ;;  %v450_v30 = vld [vmem:[%s3090_s1 + $0x498] sm:$0xff]  ;;  %v2471_v55 = vld [vmem:[%s3090_s1 + $0x500] sm:$0xff] }
  0x36   :  { %v228_v28 = vadd.f32 %v227_v12, %v226_v63  ;;  %v117_v42 = vrot.slane %v116_v20, 2  ;;  %v69_v47 = vld [vmem:[%s3089_s0 + $0x1b0] sm:$0xff]  ;;  %v131_v0 = vrot.slane %v130_v50, 2  ;;  %v2476_v62 = vld [vmem:[%s3090_s1 + $0x508] sm:$0xff] }
  0x37   :  { %1566 = vmatpush3.bf16.msra.mxu0 %v1565_v40  ;;  %v1579_v40 = vpack.c.bf16 %v2364_v11, %v2351_v5  ;;  %v221_v43 = vadd.f32 %v220_v21, %v219_v7  ;;  %v110_v49 = vrot.slane %v109_v29, 2  ;;  %v233_v58 = vadd.f32 %v69_v47, %v53_v38  ;;  %v429_v26 = vld [vmem:[%s3090_s1 + $0x3f0] sm:$0xff]  ;;  %v414_v38 = vld [vmem:[%s3090_s1 + $0x378] sm:$0xff]  ;;  %v480_v47 = vld [vmem:[%s3090_s1 + $0x588] sm:$0xff] }
  0x38   :  { %1568 = vmatprep.subr.bf16.mxu0 %v1567_v46  ;;  %1594 = vmatpush3.bf16.msra.mxu1 %v1593_v39  ;;  %v241_v46 = vrot.slane %v240_v22, 4  ;;  %v229_v48 = vrot.slane %v228_v28, 2  ;;  %v118_v56 = vadd.f32 %v117_v42, %v116_v20  ;;  %v122_v1 = vrot.slane %v121_v51, 4  ;;  %v412_v20 = vld [vmem:[%s3090_s1 + $0x368] sm:$0xff]  ;;  %v413_v37 = vld [vmem:[%s3090_s1 + $0x370] sm:$0xff]  ;;  %v479_v42 = vld [vmem:[%s3090_s1 + $0x580] sm:$0xff] }
  0x39   :  { %1596 = vmatprep.subr.bf16.mxu1 %v1595_v44  ;;  %v222_v57 = vrot.slane %v221_v43, 2  ;;  %v111_v63 = vadd.f32 %v110_v49, %v109_v29  ;;  %v381_v44 = vld [vmem:[%s3090_s1 + $0x270] sm:$0xff]  ;;  %v234_v6 = vrot.slane %v233_v58, 4  ;;  %v1609_v31 = vpack.c.bf16 %v412_v20, %v411_v18  ;;  %v434_v49 = vld [vmem:[%s3090_s1 + $0x418] sm:$0xff] }
  0x3a   :  { %v242_v39 = vadd.f32 %v241_v46, %v240_v22  ;;  %v230_v59 = vadd.f32 %v229_v48, %v228_v28  ;;  %v123_v7 = vadd.f32 %v122_v1, %v121_v51  ;;  %v432_v22 = vld [vmem:[%s3090_s1 + $0x408] sm:$0xff]  ;;  %v449_v29 = vld [vmem:[%s3090_s1 + $0x490] sm:$0xff]  ;;  %v1611_v36 = vpack.c.bf16 %v430_v34, %v429_v26  ;;  %v2486_v51 = vld [vmem:[%s3090_s1 + $0x598] sm:$0xff] }
  0x3b   :  { %1570 = vmatpush3.bf16.msra.mxu0 %v1569_v52  ;;  %v382_v52 = vld [vmem:[%s3090_s1 + $0x278] sm:$0xff]  ;;  %v223_v2 = vadd.f32 %v222_v57, %v221_v43  ;;  %v112_v17 = vrot.slane %v111_v63, 1  ;;  %v235_v12 = vadd.f32 %v234_v6, %v233_v58  ;;  %v433_v48 = vld [vmem:[%s3090_s1 + $0x410] sm:$0xff]  ;;  %v452_v57 = vld [vmem:[%s3090_s1 + $0x4a8] sm:$0xff]  ;;  %v1613_v1 = vpack.c.bf16 %v414_v38, %v413_v37 }
  0x3c   :  { %1572 = vmatprep.subr.bf16.mxu0 %v1571_v60  ;;  %1598 = vmatpush3.bf16.msra.mxu1 %v1597_v45  ;;  %v119_v60 = vrot.slane %v118_v56, 1  ;;  %v243_v5 = vrot.slane %v242_v39, 2  ;;  %v231_v16 = vrot.slane %v230_v59, 1  ;;  %v132_v45 = vadd.f32 %v131_v0, %v130_v50  ;;  %v2481_v50 = vld [vmem:[%s3090_s1 + $0x590] sm:$0xff]  ;;  %v2502_v58 = vld [vmem:[%s3090_s1 + $0x518] sm:$0xff]  ;;  %v2517_v0 = vld [vmem:[%s3090_s1 + $0x5a0] sm:$0xff] }
  0x3d   :  { %1600 = vmatprep.subr.bf16.mxu1 %v1599_v53  ;;  %v224_v9 = vrot.slane %v223_v2, 1  ;;  %v1581_v13 = vpack.c.bf16 %v382_v52, %v381_v44  ;;  %v124_v33 = vrot.slane %v123_v7, 2  ;;  %v113_v53 = vadd.f32 %v112_v17, %v111_v63  ;;  %v2512_v63 = vld [vmem:[%s3090_s1 + $0x428] sm:$0xff]  ;;  %v2537_v17 = vld [vmem:[%s3090_s1 + $0x4b0] sm:$0xff] }
  0x3e   :  { %v120_v8 = vadd.f32 %v119_v60, %v118_v56  ;;  %v244_v11 = vadd.f32 %v243_v5, %v242_v39  ;;  %v232_v14 = vadd.f32 %v231_v16, %v230_v59  ;;  %v133_v32 = vrot.slane %v132_v45, 1  ;;  %v451_v56 = vld [vmem:[%s3090_s1 + $0x4a0] sm:$0xff]  ;;  %v2497_v39 = vld [vmem:[%s3090_s1 + $0x510] sm:$0xff]  ;;  %v2522_v60 = vld [vmem:[%s3090_s1 + $0x5a8] sm:$0xff] }
  0x3f   :  { %1574 = vmatpush3.bf16.msra.mxu0 %v1573_v61  ;;  %v225_v61 = vadd.f32 %v224_v9, %v223_v2  ;;  %v236_v15 = vrot.slane %v235_v12, 2  ;;  %v125_v21 = vadd.f32 %v124_v33, %v123_v7  ;;  %v2507_v59 = vld [vmem:[%s3090_s1 + $0x420] sm:$0xff]  ;;  %v2532_v5 = vld [vmem:[%s3090_s1 + $0x528] sm:$0xff]  ;;  %v1647_v6 = vpack.c.bf16 %v480_v47, %v479_v42  ;;  %v2547_v7 = vld [vmem:[%s3090_s1 + $0x430] sm:$0xff] }
  0x40   :  { %1576 = vmatprep.subr.bf16.mxu0 %v1575_v10  ;;  %1602 = vmatpush3.bf16.msra.mxu1 %v1601_v54  ;;  %v245_v10 = vrot.slane %v244_v11, 1  ;;  %v604_v27 = vsel %vm598_vm0, %v232_v14, %v120_v8  ;;  %v134_v54 = vadd.f32 %v133_v32, %v132_v45  ;;  %v2527_v2 = vld [vmem:[%s3090_s1 + $0x520] sm:$0xff]  ;;  %v1621_v16 = vpack.c.bf16 %v434_v49, %v433_v48  ;;  %v2542_v45 = vld [vmem:[%s3090_s1 + $0x4b8] sm:$0xff]  ;;  %v2557_v9 = vld [vmem:[%s3090_s1 + $0x5b0] sm:$0xff] }
  0x41   :  { %1604 = vmatprep.subr.bf16.mxu1 %v1603_v3  ;;  %835 = vmatprep.mubr.f32.mxu0 %v604_v27  ;;  %v237_v28 = vadd.f32 %v236_v15, %v235_v12  ;;  %v126_v43 = vrot.slane %v125_v21, 1  ;;  %v603_v41 = vsel %vm598_vm0, %v225_v61, %v113_v53  ;;  %v2552_v8 = vld [vmem:[%s3090_s1 + $0x438] sm:$0xff]  ;;  %v1649_v24 = vpack.c.bf16 %v2476_v62, %v2471_v55  ;;  %v2581_v32 = vld [vmem:[%s3090_s1 + $0x4c0] sm:$0xff]  ;;  %v2586_v33 = vld [vmem:[%s3090_s1 + $0x4c8] sm:$0xff] }
  0x42   :  { %v246_v3 = vadd.f32 %v245_v10, %v244_v11  ;;  %v1623_v11 = vpack.c.bf16 %v452_v57, %v451_v56  ;;  %v2562_v12 = vld [vmem:[%s3090_s1 + $0x5b8] sm:$0xff]  ;;  %v1651_v25 = vpack.c.bf16 %v2486_v51, %v2481_v50  ;;  %v2591_v53 = vld [vmem:[%s3090_s1 + $0x440] sm:$0xff]  ;;  %v2596_v61 = vld [vmem:[%s3090_s1 + $0x448] sm:$0xff]  ;;  %v1653_v18 = vpack.c.bf16 %v2502_v58, %v2497_v39 }
  0x43   :  { %1578 = vmatpush3.bf16.msra.mxu0 %v1577_v19  ;;  %v431_v19 = vld [vmem:[%s3090_s1 + $0x400] sm:$0xff]  ;;  %v238_v46 = vrot.slane %v237_v28, 1  ;;  %v127_v44 = vadd.f32 %v126_v43, %v125_v21  ;;  %v2572_v14 = vld [vmem:[%s3090_s1 + $0x538] sm:$0xff]  ;;  %v24_v10 = vld [vmem:[%s3089_s0 + $0x48] sm:$0xff]  ;;  %v1625_v20 = vpack.c.bf16 %v2512_v63, %v2507_v59  ;;  %v1655_v26 = vpack.c.bf16 %v2522_v60, %v2517_v0 }
  0x44   :  { %1580 = vmatprep.subr.bf16.mxu0 %v1579_v40  ;;  %1606 = vmatpush3.bf16.msra.mxu1 %v1605_v4  ;;  %v606_v40 = vsel %vm598_vm0, %v246_v3, %v134_v54  ;;  %v1617_v4 = vpack.c.bf16 %v432_v22, %v431_v19  ;;  %v40_v27 = vld [vmem:[%s3089_s0 + $0xc8] sm:$0xff]  ;;  %v1657_v34 = vpack.c.bf16 %v2532_v5, %v2527_v2  ;;  %v2652_v42 = vld [vmem:[%s3090_s1 + $0x4d8] sm:$0xff]  ;;  %v71_v43 = vld [vmem:[%s3089_s0 + $0x1c0] sm:$0xff] }
  0x45   :  { %1608 = vmatprep.subr.bf16.mxu1 %v1607_v23  ;;  %905 = vmatprep.mubr.f32.mxu1 %v606_v40  ;;  %v1619_v23 = vpack.c.bf16 %v450_v30, %v449_v29  ;;  %v239_v52 = vadd.f32 %v238_v46, %v237_v28  ;;  %v56_v54 = vld [vmem:[%s3089_s0 + $0x148] sm:$0xff]  ;;  %v142_v19 = vadd.f32 %v40_v27, %v24_v10  ;;  %v23_v28 = vld [vmem:[%s3089_s0 + $0x40] sm:$0xff]  ;;  %v2647_v40 = vld [vmem:[%s3090_s1 + $0x4d0] sm:$0xff] }
  0x46   :  { %v72_v21 = vld [vmem:[%s3089_s0 + $0x1c8] sm:$0xff]  ;;  %v39_v29 = vld [vmem:[%s3089_s0 + $0xc0] sm:$0xff]  ;;  %v1629_v37 = vpack.c.bf16 %v2552_v8, %v2547_v7  ;;  %v1659_v38 = vpack.c.bf16 %v2562_v12, %v2557_v9  ;;  %v26_v48 = vld [vmem:[%s3089_s0 + $0x58] sm:$0xff]  ;;  %v1631_v62 = vpack.c.bf16 %v2586_v33, %v2581_v32 }
  0x47   :  { %1582 = vmatpush3.bf16.msra.mxu0 %v1581_v13  ;;  %v2567_v13 = vld [vmem:[%s3090_s1 + $0x530] sm:$0xff]  ;;  %v605_v15 = vsel %vm598_vm0, %v239_v52, %v127_v44  ;;  %v2627_v3 = vld [vmem:[%s3090_s1 + $0x5c8] sm:$0xff]  ;;  %v254_v22 = vadd.f32 %v72_v21, %v56_v54  ;;  %v55_v30 = vld [vmem:[%s3089_s0 + $0x140] sm:$0xff]  ;;  %v135_v46 = vadd.f32 %v39_v29, %v23_v28 }
  0x48   :  { %1616 = vmatprep.subr.bf16.mxu0 %v1615_v35  ;;  %1610 = vmatpush3.bf16.msra.mxu1 %v1609_v31  ;;  %v2622_v35 = vld [vmem:[%s3090_s1 + $0x5c0] sm:$0xff]  ;;  %v1627_v31 = vpack.c.bf16 %v2542_v45, %v2537_v17  ;;  %v247_v47 = vadd.f32 %v71_v43, %v55_v30  ;;  %v42_v49 = vld [vmem:[%s3089_s0 + $0xd8] sm:$0xff]  ;;  %v25_v63 = vld [vmem:[%s3089_s0 + $0x50] sm:$0xff] }
  0x49   :  { %1612 = vmatprep.subr.bf16.mxu1 %v1611_v36  ;;  %v1661_v36 = vpack.c.bf16 %v2572_v14, %v2567_v13  ;;  %v58_v55 = vld [vmem:[%s3089_s0 + $0x158] sm:$0xff]  ;;  %v136_v50 = vrot.slane %v135_v46, 4  ;;  %v156_v56 = vadd.f32 %v42_v49, %v26_v48  ;;  %v1663_v0 = vpack.c.bf16 %v2627_v3, %v2622_v35  ;;  %v41_v60 = vld [vmem:[%s3089_s0 + $0xd0] sm:$0xff]  ;;  %v443_v48 = vld [vmem:[%s3090_s1 + $0x460] sm:$0xff] }
  0x4a   :  { %836 = vmatmul.mubr.f32.vlgmr.msra.gmra.mrb[2].mxu0 %v603_v41  ;;  %v143_v41 = vrot.slane %v142_v19, 4  ;;  %v74_v51 = vld [vmem:[%s3089_s0 + $0x1d8] sm:$0xff]  ;;  %v248_v58 = vrot.slane %v247_v47, 4  ;;  %v441_v17 = vld [vmem:[%s3090_s1 + $0x450] sm:$0xff]  ;;  %v149_v33 = vadd.f32 %v41_v60, %v25_v63  ;;  %v444_v9 = vld [vmem:[%s3090_s1 + $0x468] sm:$0xff] }
  0x4b   :  { %1618 = vmatpush3.bf16.msra.mxu0 %v1617_v4  ;;  %v255_v4 = vrot.slane %v254_v22, 4  ;;  %v268_v59 = vadd.f32 %v74_v51, %v58_v55  ;;  %v137_v44 = vadd.f32 %v136_v50, %v135_v46  ;;  %v157_v52 = vrot.slane %v156_v56, 4  ;;  %v442_v45 = vld [vmem:[%s3090_s1 + $0x458] sm:$0xff]  ;;  %v489_v2 = vld [vmem:[%s3090_s1 + $0x5d0] sm:$0xff]  ;;  %v491_v14 = vld [vmem:[%s3090_s1 + $0x5e0] sm:$0xff] }
  0x4c   :  { %1620 = vmatprep.subr.bf16.mxu0 %v1619_v23  ;;  %1614 = vmatpush3.bf16.msra.mxu1 %v1613_v1  ;;  %v1633_v23 = vpack.c.bf16 %v2596_v61, %v2591_v53  ;;  %v144_v57 = vadd.f32 %v143_v41, %v142_v19  ;;  %v1635_v1 = vpack.c.bf16 %v2652_v42, %v2647_v40  ;;  %v150_v21 = vrot.slane %v149_v33, 4  ;;  %v490_v5 = vld [vmem:[%s3090_s1 + $0x5d8] sm:$0xff]  ;;  %v461_v49 = vld [vmem:[%s3090_s1 + $0x4f0] sm:$0xff]  ;;  %v512_v60 = vld [vmem:[%s3090_s1 + $0x688] sm:$0xff] }
  0x4d   :  { %1648 = vmatprep.subr.bf16.mxu1 %v1647_v6  ;;  %v256_v39 = vadd.f32 %v255_v4, %v254_v22  ;;  %v57_v6 = vld [vmem:[%s3089_s0 + $0x150] sm:$0xff]  ;;  %v158_v32 = vadd.f32 %v157_v52, %v156_v56  ;;  %v1637_v27 = vpack.c.bf16 %v442_v45, %v441_v17  ;;  %v459_v22 = vld [vmem:[%s3090_s1 + $0x4e0] sm:$0xff]  ;;  %v462_v55 = vld [vmem:[%s3090_s1 + $0x4f8] sm:$0xff]  ;;  %v1667_v50 = vpack.c.bf16 %v490_v5, %v489_v2 }
  0x4e   :  { %v145_v7 = vrot.slane %v144_v57, 2  ;;  %v151_v43 = vadd.f32 %v150_v21, %v149_v33  ;;  %v473_v51 = vld [vmem:[%s3090_s1 + $0x550] sm:$0xff]  ;;  %v474_v56 = vld [vmem:[%s3090_s1 + $0x558] sm:$0xff]  ;;  %v1641_v13 = vpack.c.bf16 %v444_v9, %v443_v48  ;;  %v511_v52 = vld [vmem:[%s3090_s1 + $0x680] sm:$0xff] }
  0x4f   :  { %1622 = vmatpush3.bf16.msra.mxu0 %v1621_v16  ;;  %906 = vmatmul.mubr.f32.vlgmr.msra.gmra.mrb[2].mxu1 %v605_v15  ;;  %v73_v16 = vld [vmem:[%s3089_s0 + $0x1d0] sm:$0xff]  ;;  %v257_v8 = vrot.slane %v256_v39, 2  ;;  %v159_v54 = vrot.slane %v158_v32, 2  ;;  %v446_v3 = vld [vmem:[%s3090_s1 + $0x478] sm:$0xff]  ;;  %v2859_v9 = vld [vmem:[%s3090_s1 + $0x620] sm:$0xff] }
  0x50   :  { %1624 = vmatprep.subr.bf16.mxu0 %v1623_v11  ;;  %1650 = vmatpush3.bf16.msra.mxu1 %v1649_v24  ;;  %v249_v11 = vadd.f32 %v248_v58, %v247_v47  ;;  %v269_v24 = vrot.slane %v268_v59, 4  ;;  %v261_v53 = vadd.f32 %v73_v16, %v57_v6  ;;  %v146_v61 = vadd.f32 %v145_v7, %v144_v57  ;;  %v445_v35 = vld [vmem:[%s3090_s1 + $0x470] sm:$0xff]  ;;  %v475_v7 = vld [vmem:[%s3090_s1 + $0x560] sm:$0xff]  ;;  %v494_v33 = vld [vmem:[%s3090_s1 + $0x5f8] sm:$0xff] }
  0x51   :  { %1652 = vmatprep.subr.bf16.mxu1 %v1651_v25  ;;  %v138_v25 = vrot.slane %v137_v44, 2  ;;  %v258_v10 = vadd.f32 %v257_v8, %v256_v39  ;;  %v160_v42 = vadd.f32 %v159_v54, %v158_v32  ;;  %v152_v39 = vrot.slane %v151_v43, 2  ;;  %v476_v8 = vld [vmem:[%s3090_s1 + $0x568] sm:$0xff]  ;;  %v2797_v21 = vld [vmem:[%s3090_s1 + $0x578] sm:$0xff]  ;;  %v2836_v2 = vld [vmem:[%s3090_s1 + $0x790] sm:$0xff] }
  0x52   :  { %v250_v15 = vrot.slane %v249_v11, 2  ;;  %v262_v19 = vrot.slane %v261_v53, 4  ;;  %v147_v28 = vrot.slane %v146_v61, 1  ;;  %v1673_v54 = vpack.c.bf16 %v476_v8, %v475_v7  ;;  %v2841_v5 = vld [vmem:[%s3090_s1 + $0x798] sm:$0xff] }
  0x53   :  { %1626 = vmatpush3.bf16.msra.mxu0 %v1625_v20  ;;  %v270_v20 = vadd.f32 %v269_v24, %v268_v59  ;;  %v139_v29 = vadd.f32 %v138_v25, %v137_v44  ;;  %v161_v12 = vrot.slane %v160_v42, 1  ;;  %v1643_v44 = vpack.c.bf16 %v462_v55, %v461_v49  ;;  %v493_v24 = vld [vmem:[%s3090_s1 + $0x5f0] sm:$0xff]  ;;  %v76_v49 = vld [vmem:[%s3089_s0 + $0x1e8] sm:$0xff]  ;;  %v518_v8 = vld [vmem:[%s3090_s1 + $0x6b8] sm:$0xff] }
  0x54   :  { %1628 = vmatprep.subr.bf16.mxu0 %v1627_v31  ;;  %1654 = vmatpush3.bf16.msra.mxu1 %v1653_v18  ;;  %v460_v18 = vld [vmem:[%s3090_s1 + $0x4e8] sm:$0xff]  ;;  %v471_v31 = vld [vmem:[%s3090_s1 + $0x540] sm:$0xff]  ;;  %v251_v40 = vadd.f32 %v250_v15, %v249_v11  ;;  %v263_v46 = vadd.f32 %v262_v19, %v261_v53  ;;  %v153_v17 = vadd.f32 %v152_v39, %v151_v43  ;;  %v2786_v15 = vld [vmem:[%s3090_s1 + $0x570] sm:$0xff] }
  0x55   :  { %1656 = vmatprep.subr.bf16.mxu1 %v1655_v26  ;;  %v259_v26 = vrot.slane %v258_v10, 1  ;;  %v271_v30 = vrot.slane %v270_v20, 2  ;;  %v1639_v47 = vpack.c.bf16 %v460_v18, %v459_v22  ;;  %v162_v57 = vadd.f32 %v161_v12, %v160_v42  ;;  %v2802_v19 = vld [vmem:[%s3090_s1 + $0x780] sm:$0xff]  ;;  %v2807_v22 = vld [vmem:[%s3090_s1 + $0x788] sm:$0xff] }
  0x56   :  { %v264_v58 = vrot.slane %v263_v46, 2  ;;  %v140_v59 = vrot.slane %v139_v29, 1  ;;  %v252_v63 = vrot.slane %v251_v40, 1  ;;  %v1645_v11 = vpack.c.bf16 %v446_v3, %v445_v35  ;;  %v2826_v42 = vld [vmem:[%s3090_s1 + $0x700] sm:$0xff]  ;;  %v2831_v43 = vld [vmem:[%s3090_s1 + $0x708] sm:$0xff]  ;;  %v62_v35 = vld [vmem:[%s3089_s0 + $0x178] sm:$0xff] }
  0x57   :  { %1630 = vmatpush3.bf16.msra.mxu0 %v1629_v37  ;;  %v472_v37 = vld [vmem:[%s3090_s1 + $0x548] sm:$0xff]  ;;  %v260_v41 = vadd.f32 %v259_v26, %v258_v10  ;;  %v272_v4 = vadd.f32 %v271_v30, %v270_v20  ;;  %v1679_v53 = vpack.c.bf16 %v512_v60, %v511_v52  ;;  %v513_v20 = vld [vmem:[%s3090_s1 + $0x690] sm:$0xff]  ;;  %v154_v18 = vrot.slane %v153_v17, 1  ;;  %v75_v39 = vld [vmem:[%s3089_s0 + $0x1e0] sm:$0xff] }
  0x58   :  { %1632 = vmatprep.subr.bf16.mxu0 %v1631_v62  ;;  %1658 = vmatpush3.bf16.msra.mxu1 %v1657_v34  ;;  %v148_v34 = vadd.f32 %v147_v28, %v146_v61  ;;  %v265_v45 = vadd.f32 %v264_v58, %v263_v46  ;;  %v141_v25 = vadd.f32 %v140_v59, %v139_v29  ;;  %v495_v61 = vld [vmem:[%s3090_s1 + $0x600] sm:$0xff]  ;;  %v496_v10 = vld [vmem:[%s3090_s1 + $0x608] sm:$0xff]  ;;  %v517_v60 = vld [vmem:[%s3090_s1 + $0x6b0] sm:$0xff] }
  0x59   :  { %1660 = vmatprep.subr.bf16.mxu1 %v1659_v38  ;;  %v1665_v38 = vpack.c.bf16 %v472_v37, %v471_v31  ;;  %v253_v32 = vadd.f32 %v252_v63, %v251_v40  ;;  %v1675_v26 = vpack.c.bf16 %v494_v33, %v493_v24  ;;  %v1681_v30 = vpack.c.bf16 %v496_v10, %v495_v61  ;;  %v2813_v31 = vld [vmem:[%s3090_s1 + $0x610] sm:$0xff]  ;;  %v498_v37 = vld [vmem:[%s3090_s1 + $0x618] sm:$0xff]  ;;  %v2821_v40 = vld [vmem:[%s3090_s1 + $0x6a0] sm:$0xff] }
  0x5a   :  { %v608_v62 = vsel %vm598_vm0, %v260_v41, %v148_v34  ;;  %v266_v28 = vrot.slane %v265_v45, 1  ;;  %v516_v34 = vld [vmem:[%s3090_s1 + $0x6a8] sm:$0xff]  ;;  %v1711_v48 = vpack.c.bf16 %v2807_v22, %v2802_v19  ;;  %v1685_v58 = vpack.c.bf16 %v498_v37, %v2813_v31 }
  0x5b   :  { %1634 = vmatpush3.bf16.msra.mxu0 %v1633_v23  ;;  %v273_v23 = vrot.slane %v272_v4, 1  ;;  %975 = vmatprep.mubr.f32.mxu0 %v608_v62  ;;  %v607_v29 = vsel %vm598_vm0, %v253_v32, %v141_v25  ;;  %v28_v41 = vld [vmem:[%s3089_s0 + $0x68] sm:$0xff]  ;;  %v27_v62 = vld [vmem:[%s3089_s0 + $0x60] sm:$0xff]  ;;  %v1687_v3 = vpack.c.bf16 %v516_v34, %v2821_v40  ;;  %v1715_v7 = vpack.c.bf16 %v2841_v5, %v2836_v2 }
  0x5c   :  { %1636 = vmatprep.subr.bf16.mxu0 %v1635_v1  ;;  %1662 = vmatpush3.bf16.msra.mxu1 %v1661_v36  ;;  %v492_v36 = vld [vmem:[%s3090_s1 + $0x5e8] sm:$0xff] }
  0x5d   :  { %1664 = vmatprep.subr.bf16.mxu1 %v1663_v0  ;;  %v274_v1 = vadd.f32 %v273_v23, %v272_v4  ;;  %v1669_v0 = vpack.c.bf16 %v474_v56, %v473_v51  ;;  %v1671_v16 = vpack.c.bf16 %v492_v36, %v491_v14  ;;  %v44_v4 = vld [vmem:[%s3089_s0 + $0xe8] sm:$0xff]  ;;  %v155_v23 = vadd.f32 %v154_v18, %v153_v17  ;;  %v43_v56 = vld [vmem:[%s3089_s0 + $0xe0] sm:$0xff]  ;;  %v2893_v14 = vld [vmem:[%s3090_s1 + $0x718] sm:$0xff] }
  0x5e   :  { %v2864_v12 = vld [vmem:[%s3090_s1 + $0x628] sm:$0xff]  ;;  %v170_v55 = vadd.f32 %v44_v4, %v28_v41  ;;  %v163_v59 = vadd.f32 %v43_v56, %v27_v62 }
  0x5f   :  { %1638 = vmatpush3.bf16.msra.mxu0 %v1637_v27  ;;  %v610_v6 = vsel %vm598_vm0, %v274_v1, %v162_v57  ;;  %v514_v27 = vld [vmem:[%s3090_s1 + $0x698] sm:$0xff]  ;;  %v59_v57 = vld [vmem:[%s3089_s0 + $0x160] sm:$0xff]  ;;  %v2913_v52 = vld [vmem:[%s3090_s1 + $0x7a8] sm:$0xff] }
  0x60   :  { %1640 = vmatprep.subr.bf16.mxu0 %v1639_v47  ;;  %1666 = vmatpush3.bf16.msra.mxu1 %v1665_v38  ;;  %v1683_v46 = vpack.c.bf16 %v514_v27, %v513_v20  ;;  %v1677_v47 = vpack.c.bf16 %v2797_v21, %v2786_v15  ;;  %v60_v38 = vld [vmem:[%s3089_s0 + $0x168] sm:$0xff]  ;;  %v171_v36 = vrot.slane %v170_v55, 4  ;;  %v275_v63 = vadd.f32 %v75_v39, %v59_v57  ;;  %v30_v1 = vld [vmem:[%s3089_s0 + $0x78] sm:$0xff] }
  0x61   :  { %1045 = vmatprep.mubr.f32.mxu1 %v610_v6  ;;  %1668 = vmatprep.subr.bf16.mxu1 %v1667_v50  ;;  %v267_v50 = vadd.f32 %v266_v28, %v265_v45  ;;  %v282_v51 = vadd.f32 %v76_v49, %v60_v38  ;;  %v1713_v45 = vpack.c.bf16 %v2831_v43, %v2826_v42 }
  0x62   :  { %v172_v24 = vadd.f32 %v171_v36, %v170_v55 }
  0x63   :  { %1642 = vmatpush3.bf16.msra.mxu0 %v1641_v13  ;;  %v2888_v13 = vld [vmem:[%s3090_s1 + $0x710] sm:$0xff]  ;;  %v283_v6 = vrot.slane %v282_v51, 4 }
  0x64   :  { %1644 = vmatprep.subr.bf16.mxu0 %v1643_v44  ;;  %1670 = vmatpush3.bf16.msra.mxu1 %v1669_v0  ;;  %v46_v44 = vld [vmem:[%s3089_s0 + $0xf8] sm:$0xff]  ;;  %v2908_v0 = vld [vmem:[%s3090_s1 + $0x7a0] sm:$0xff] }
  0x65   :  { %1672 = vmatprep.subr.bf16.mxu1 %v1671_v16  ;;  %v78_v16 = vld [vmem:[%s3089_s0 + $0x1f8] sm:$0xff]  ;;  %v184_v17 = vadd.f32 %v46_v44, %v30_v1 }
  0x66   :  { %v296_v25 = vadd.f32 %v78_v16, %v62_v35 }
  0x67   :  { %1646 = vmatpush3.bf16.msra.mxu0 %v1645_v11  ;;  %v2931_v11 = vld [vmem:[%s3090_s1 + $0x630] sm:$0xff] }
  0x68   :  { %1680 = vmatprep.subr.bf16.mxu0 %v1679_v53  ;;  %1674 = vmatpush3.bf16.msra.mxu1 %v1673_v54 }
  0x69   :  { %1676 = vmatprep.subr.bf16.mxu1 %v1675_v26 }
  0x6a   :  { %976 = vmatmul.mubr.f32.vlgmr.msra.gmra.mrb[4].mxu0 %v607_v29 }
  0x6b   :  { %1682 = vmatpush3.bf16.msra.mxu0 %v1681_v30 }
  0x6c   :  { %1684 = vmatprep.subr.bf16.mxu0 %v1683_v46 }
  0x6d   :  { %8 = vsyncpa [#allocation3], 0  ;;  %1678 = vmatpush3.bf16.msra.mxu1 %v1677_v47  ;;  %v609_v32 = vsel %vm598_vm0, %v267_v50, %v155_v23  ;;  %v1689_v33 = vpack.c.bf16 %v2864_v12, %v2859_v9  ;;  %v502_v53 = vld [vmem:[%s3090_s1 + $0x638] sm:$0xff]  ;;  %v284_v61 = vadd.f32 %v283_v6, %v282_v51  ;;  %v185_v10 = vrot.slane %v184_v17, 4  ;;  %v29_v15 = vld [vmem:[%s3089_s0 + $0x70] sm:$0xff] }
  0x6e   :  { %v45_v20 = vld [vmem:[%s3089_s0 + $0xf0] sm:$0xff]  ;;  %1712 = vmatprep.subr.bf16.mxu1 %v1711_v48  ;;  %v173_v27 = vrot.slane %v172_v24, 2  ;;  %v164_v54 = vrot.slane %v163_v59, 4  ;;  %v276_v21 = vrot.slane %v275_v63, 4  ;;  %v297_v19 = vrot.slane %v296_v25, 4  ;;  %v531_v37 = vld [vmem:[%s3090_s1 + $0x720] sm:$0xff] }
  0x6f   :  { %1686 = vmatpush3.bf16.msra.mxu0 %v1685_v58  ;;  %v61_v22 = vld [vmem:[%s3089_s0 + $0x170] sm:$0xff]  ;;  %v1717_v28 = vpack.c.bf16 %v2893_v14, %v2888_v13  ;;  %v1691_v26 = vpack.c.bf16 %v518_v8, %v517_v60  ;;  %v285_v29 = vrot.slane %v284_v61, 2  ;;  %v186_v30 = vadd.f32 %v185_v10, %v184_v17  ;;  %v519_v42 = vld [vmem:[%s3090_s1 + $0x6c0] sm:$0xff]  ;;  %v520_v43 = vld [vmem:[%s3090_s1 + $0x6c8] sm:$0xff] }
  0x70   :  { %v77_v18 = vld [vmem:[%s3089_s0 + $0x1f0] sm:$0xff]  ;;  %1688 = vmatprep.subr.bf16.mxu0 %v1687_v3  ;;  %1046 = vmatmul.mubr.f32.vlgmr.msra.gmra.mrb[4].mxu1 %v609_v32  ;;  %v1719_v31 = vpack.c.bf16 %v2913_v52, %v2908_v0  ;;  %v1693_v40 = vpack.c.bf16 %v502_v53, %v2931_v11  ;;  %v174_v46 = vadd.f32 %v173_v27, %v172_v24  ;;  %v532_v5 = vld [vmem:[%s3090_s1 + $0x728] sm:$0xff]  ;;  %v550_v41 = vld [vmem:[%s3090_s1 + $0x7b8] sm:$0xff] }
  0x71   :  { %v298_v2 = vadd.f32 %v297_v19, %v296_v25  ;;  %1714 = vmatpush3.bf16.msra.mxu1 %v1713_v45  ;;  %v549_v34 = vld [vmem:[%s3090_s1 + $0x7b0] sm:$0xff]  ;;  %v286_v4 = vadd.f32 %v285_v29, %v284_v61  ;;  %v187_v47 = vrot.slane %v186_v30, 2  ;;  %v177_v48 = vadd.f32 %v45_v20, %v29_v15  ;;  %v503_v23 = vld [vmem:[%s3090_s1 + $0x640] sm:$0xff]  ;;  %v504_v50 = vld [vmem:[%s3090_s1 + $0x648] sm:$0xff] }
  0x72   :  { %v289_v9 = vadd.f32 %v77_v18, %v61_v22  ;;  %1716 = vmatprep.subr.bf16.mxu1 %v1715_v7  ;;  %v175_v12 = vrot.slane %v174_v46, 1  ;;  %v165_v38 = vadd.f32 %v164_v54, %v163_v59  ;;  %v277_v49 = vadd.f32 %v276_v21, %v275_v63  ;;  %v521_v58 = vld [vmem:[%s3090_s1 + $0x6d0] sm:$0xff]  ;;  %v522_v13 = vld [vmem:[%s3090_s1 + $0x6d8] sm:$0xff]  ;;  %v551_v1 = vld [vmem:[%s3090_s1 + $0x7c0] sm:$0xff] }
  0x73   :  { %1690 = vmatpush3.bf16.msra.mxu0 %v1689_v33  ;;  %v299_v55 = vrot.slane %v298_v2, 2  ;;  %v1695_v62 = vpack.c.bf16 %v520_v43, %v519_v42  ;;  %v287_v51 = vrot.slane %v286_v4, 1  ;;  %v188_v56 = vadd.f32 %v187_v47, %v186_v30  ;;  %v533_v59 = vld [vmem:[%s3090_s1 + $0x730] sm:$0xff]  ;;  %v534_v63 = vld [vmem:[%s3090_s1 + $0x738] sm:$0xff]  ;;  %v552_v60 = vld [vmem:[%s3090_s1 + $0x7c8] sm:$0xff] }
  0x74   :  { %1692 = vmatprep.subr.bf16.mxu0 %v1691_v26  ;;  %v1721_v57 = vpack.c.bf16 %v532_v5, %v531_v37  ;;  %v1723_v39 = vpack.c.bf16 %v550_v41, %v549_v34  ;;  %v176_v14 = vadd.f32 %v175_v12, %v174_v46  ;;  %v178_v3 = vrot.slane %v177_v48, 4  ;;  %v505_v6 = vld [vmem:[%s3090_s1 + $0x650] sm:$0xff]  ;;  %v506_v16 = vld [vmem:[%s3090_s1 + $0x658] sm:$0xff]  ;;  %v523_v32 = vld [vmem:[%s3090_s1 + $0x6e0] sm:$0xff] }
  0x75   :  { %v300_v36 = vadd.f32 %v299_v55, %v298_v2  ;;  %1718 = vmatpush3.bf16.msra.mxu1 %v1717_v28  ;;  %v288_v44 = vadd.f32 %v287_v51, %v286_v4  ;;  %v189_v35 = vrot.slane %v188_v56, 1  ;;  %v290_v0 = vrot.slane %v289_v9, 4  ;;  %v524_v33 = vld [vmem:[%s3090_s1 + $0x6e8] sm:$0xff]  ;;  %v535_v27 = vld [vmem:[%s3090_s1 + $0x740] sm:$0xff]  ;;  %v553_v21 = vld [vmem:[%s3090_s1 + $0x7d0] sm:$0xff] }
  0x76   :  { %1720 = vmatprep.subr.bf16.mxu1 %v1719_v31  ;;  %v1697_v52 = vpack.c.bf16 %v504_v50, %v503_v23  ;;  %v166_v17 = vrot.slane %v165_v38, 2  ;;  %v278_v45 = vrot.slane %v277_v49, 2  ;;  %v1699_v8 = vpack.c.bf16 %v522_v13, %v521_v58  ;;  %v536_v54 = vld [vmem:[%s3090_s1 + $0x748] sm:$0xff]  ;;  %v554_v28 = vld [vmem:[%s3090_s1 + $0x7d8] sm:$0xff]  ;;  %v507_v29 = vld [vmem:[%s3090_s1 + $0x660] sm:$0xff] }
  0x77   :  { %1694 = vmatpush3.bf16.msra.mxu0 %v1693_v40  ;;  %v301_v7 = vrot.slane %v300_v36, 1  ;;  %v612_v11 = vsel %vm598_vm0, %v288_v44, %v176_v14  ;;  %v190_v24 = vadd.f32 %v189_v35, %v188_v56  ;;  %v1725_v25 = vpack.c.bf16 %v534_v63, %v533_v59  ;;  %v508_v30 = vld [vmem:[%s3090_s1 + $0x668] sm:$0xff]  ;;  %v525_v31 = vld [vmem:[%s3090_s1 + $0x6f0] sm:$0xff]  ;;  %v526_v37 = vld [vmem:[%s3090_s1 + $0x6f8] sm:$0xff] }
  0x78   :  { %1696 = vmatprep.subr.bf16.mxu0 %v1695_v62  ;;  %1115 = vmatprep.mubr.f32.mxu0 %v612_v11  ;;  %v1727_v61 = vpack.c.bf16 %v552_v60, %v551_v1  ;;  %v1701_v10 = vpack.c.bf16 %v506_v16, %v505_v6  ;;  %v179_v15 = vadd.f32 %v178_v3, %v177_v48  ;;  %v537_v42 = vld [vmem:[%s3090_s1 + $0x750] sm:$0xff]  ;;  %v538_v5 = vld [vmem:[%s3090_s1 + $0x758] sm:$0xff]  ;;  %v555_v41 = vld [vmem:[%s3090_s1 + $0x7e0] sm:$0xff] }
  0x79   :  { %v302_v53 = vadd.f32 %v301_v7, %v300_v36  ;;  %1722 = vmatpush3.bf16.msra.mxu1 %v1721_v57  ;;  %v291_v20 = vadd.f32 %v290_v0, %v289_v9  ;;  %v167_v19 = vadd.f32 %v166_v17, %v165_v38  ;;  %v279_v22 = vadd.f32 %v278_v45, %v277_v49  ;;  %v556_v4 = vld [vmem:[%s3090_s1 + $0x7e8] sm:$0xff]  ;;  %v509_v12 = vld [vmem:[%s3090_s1 + $0x670] sm:$0xff]  ;;  %v510_v38 = vld [vmem:[%s3090_s1 + $0x678] sm:$0xff] }
  0x7a   :  { %1724 = vmatprep.subr.bf16.mxu1 %v1723_v39  ;;  %v1703_v26 = vpack.c.bf16 %v524_v33, %v523_v32  ;;  %v1729_v40 = vpack.c.bf16 %v536_v54, %v535_v27  ;;  %v180_v43 = vrot.slane %v179_v15, 2  ;;  %v1731_v2 = vpack.c.bf16 %v554_v28, %v553_v21  ;;  %v539_v50 = vld [vmem:[%s3090_s1 + $0x760] sm:$0xff]  ;;  %v540_v51 = vld [vmem:[%s3090_s1 + $0x768] sm:$0xff]  ;;  %v557_v58 = vld [vmem:[%s3090_s1 + $0x7f0] sm:$0xff] }
  0x7b   :  { %1698 = vmatpush3.bf16.msra.mxu0 %v1697_v52  ;;  %v614_v18 = vsel %vm598_vm0, %v302_v53, %v190_v24  ;;  %v292_v46 = vrot.slane %v291_v20, 2  ;;  %v1705_v34 = vpack.c.bf16 %v508_v30, %v507_v29  ;;  %v168_v47 = vrot.slane %v167_v19, 1  ;;  %v558_v13 = vld [vmem:[%s3090_s1 + $0x7f8] sm:$0xff]  ;;  %v541_v1 = vld [vmem:[%s3090_s1 + $0x770] sm:$0xff]  ;;  %v1206_v45 = vld [vmem:[%s3091_s2] ss:$0 sm:$0xff] }
  0x7c   :  { %1700 = vmatprep.subr.bf16.mxu0 %v1699_v8  ;;  %1185 = vmatprep.mubr.f32.mxu1 %v614_v18  ;;  %v280_v48 = vrot.slane %v279_v22, 1  ;;  %v1707_v9 = vpack.c.bf16 %v526_v37, %v525_v31  ;;  %v1733_v49 = vpack.c.bf16 %v538_v5, %v537_v42  ;;  %v1735_v55 = vpack.c.bf16 %v556_v4, %v555_v41  ;;  %v542_v44 = vld [vmem:[%s3090_s1 + $0x778] sm:$0xff]  ;;  %s1768_s1 = smov [#allocation2]  }
  0x7d   :  { %1726 = vmatpush3.bf16.msra.mxu1 %v1725_v25  ;;  %v181_v62 = vadd.f32 %v180_v43, %v179_v15  ;;  %v293_v23 = vadd.f32 %v292_v46, %v291_v20  ;;  %v1709_v56 = vpack.c.bf16 %v510_v38, %v509_v12  ;;  %v169_v57 = vadd.f32 %v168_v47, %v167_v19  ;;  %s1198_s2 = sshll.u32 %s1768_s1, 4  ;;  %s1199_s2 = int_to_ptr.vmem [resolvable:$true] %s1198_s2 }
  0x7e   :  { %1728 = vmatprep.subr.bf16.mxu1 %v1727_v61  ;;  %v281_v39 = vadd.f32 %v280_v48, %v279_v22  ;;  %v1737_v14 = vpack.c.bf16 %v540_v51, %v539_v50  ;;  %v1739_v63 = vpack.c.bf16 %v558_v13, %v557_v58  ;;  %v1741_v3 = vpack.c.bf16 %v542_v44, %v541_v1  ;;  %s1744_s30 = scalar_lea.vmem %s1199_s2, 32  ;;  %p1749_p1 = scmp.lt.s32.totalorder %s1199_s2, %s1199_s2 }
  0x7f   :  { %1702 = vmatpush3.bf16.msra.mxu0 %v1701_v10  ;;  %v182_v36 = vrot.slane %v181_v62, 1  ;;  %v294_v59 = vrot.slane %v293_v23, 1  ;;  %p1745_p0 = scmp.ne.s32.totalorder %s1199_s2, %s1744_s30  ;;  %p1750_p2 = scmp.lt.s32.totalorder %s1744_s30, %s1744_s30 }
  0x80   :  { %1704 = vmatprep.subr.bf16.mxu0 %v1703_v26  ;;  %v611_v35 = vsel %vm598_vm0, %v281_v39, %v169_v57 }
  0x81   :  { %1730 = vmatpush3.bf16.msra.mxu1 %v1729_v40  ;;  %v183_v0 = vadd.f32 %v182_v36, %v181_v62  ;;  %v295_v52 = vadd.f32 %v294_v59, %v293_v23  ;;  %p1751_p3 = por %p1750_p2, %p1749_p1 }
  0x82   :  { %1732 = vmatprep.subr.bf16.mxu1 %v1731_v2 }
  0x83   :  { %1706 = vmatpush3.bf16.msra.mxu0 %v1705_v34  ;;  %v613_v60 = vsel %vm598_vm0, %v295_v52, %v183_v0  ;;  %p1752_p4 = pnand %p1751_p3, %p1745_p0 }
  0x84   :  { %1708 = vmatprep.subr.bf16.mxu0 %v1707_v9 }
  0x85   :  { %1734 = vmatpush3.bf16.msra.mxu1 %v1733_v49 }
  0x86   :  { %1736 = vmatprep.subr.bf16.mxu1 %v1735_v55 }
  0x87   :  { %1710 = vmatpush3.bf16.msra.mxu0 %v1709_v56 }
  0x89   :  { %1738 = vmatpush3.bf16.msra.mxu1 %v1737_v14 }
  0x8a   :  { %1116 = vmatmul.mubr.f32.vlgmr.msra.gmra.mrb[6].mxu0 %v611_v35  ;;  %1740 = vmatprep.subr.bf16.mxu1 %v1739_v63 }
  0x8d   :  { %1742 = vmatpush3.bf16.msra.mxu1 %v1741_v3 }
  0x90   :  { %1186 = vmatmul.mubr.f32.vlgmr.msra.gmra.mrb[6].mxu1 %v613_v60 }
  0xfd   :  { %v1239_v6 = vpop.f32.mrb[0].mxu0 }
  0xfe   :  { %v1240_v16 = vpop.f32.mrb[1].mxu0 }
  0xff   :  { %v1241_v17 = vadd.f32 %v1240_v16, %v1239_v6 }
 0x101   :  { %v698_v7 = vadd.f32 %v1241_v17, %v1206_v45 }
 0x102   :  { %v1274_v8 = vpop.f32.mrb[0].mxu1 }
 0x103   :  { %v1275_v11 = vpop.f32.mrb[1].mxu1 }
 0x104   :  { %v1276_v24 = vadd.f32 %v1275_v11, %v1274_v8 }
 0x106   :  { %v768_v25 = vadd.f32 %v1276_v24, %v698_v7 }
 0x11d   :  { %v1309_v32 = vpop.f32.mrb[2].mxu0 }
 0x11e   :  { %v1310_v33 = vpop.f32.mrb[3].mxu0 }
 0x11f   :  { %v1311_v53 = vadd.f32 %v1310_v33, %v1309_v32 }
 0x121   :  { %v838_v61 = vadd.f32 %v1311_v53, %v768_v25 }
 0x122   :  { %v1344_v10 = vpop.f32.mrb[2].mxu1 }
 0x123   :  { %v1345_v15 = vpop.f32.mrb[3].mxu1 }
 0x124   :  { %v1346_v20 = vadd.f32 %v1345_v15, %v1344_v10 }
 0x126   :  { %v908_v27 = vadd.f32 %v1346_v20, %v838_v61 }
 0x13d   :  { %v1379_v54 = vpop.f32.mrb[4].mxu0 }
 0x13e   :  { %v1380_v21 = vpop.f32.mrb[5].mxu0 }
 0x13f   :  { %v1381_v19 = vadd.f32 %v1380_v21, %v1379_v54 }
 0x141   :  { %v978_v22 = vadd.f32 %v1381_v19, %v908_v27 }
 0x143   :  { %v1414_v18 = vpop.f32.mrb[4].mxu1 }
 0x144   :  { %v1415_v28 = vpop.f32.mrb[5].mxu1 }
 0x145   :  { %v1416_v26 = vadd.f32 %v1415_v28, %v1414_v18 }
 0x147   :  { %v1048_v29 = vadd.f32 %v1416_v26, %v978_v22 }
 0x15d   :  { %v1449_v30 = vpop.f32.mrb[6].mxu0 }
 0x15e   :  { %v1450_v31 = vpop.f32.mrb[7].mxu0 }
 0x15f   :  { %v1451_v37 = vadd.f32 %v1450_v31, %v1449_v30 }
 0x161   :  { %v1118_v40 = vadd.f32 %v1451_v37, %v1048_v29 }
 0x163   :  { %v1484_v42 = vpop.f32.mrb[6].mxu1 }
 0x164   :  { %v1485_v43 = vpop.f32.mrb[7].mxu1 }
 0x165   :  { %v1486_v46 = vadd.f32 %v1485_v43, %v1484_v42 }
 0x167   :  { %v1188_v2 = vadd.f32 %v1486_v46, %v1118_v40 }
 0x169   :  { %1191 = vst [vmem:[#allocation2] sm:$0x3] %v1188_v2 }
 0x16a   :  { %1755 = shalt.err (!%p1752_p4)
}
 0x16b   :  { %s1756_s6 = scalar_lea.hbm %s3092_s3, 32 }
 0x16c   :  { %p1757_p5 = scmp.ne.s32.totalorder %s3092_s3, %s1756_s6  ;;  %p1760_p6 = scmp.lt.u32.totalorder %s1756_s6, %s3092_s3 }
 0x16e   :  { %p1762_p7 = pnand %p1760_p6, %p1757_p5 }
 0x170   :  { %1765 = shalt.err (!%p1762_p7)
}
 0x171   :  { %1201 = dma.vmem_to_hbm [thread:$0]  %s1199_s2, 32, %s3092_s3, [#allocation3]  }
 0x172   :  { %1766 = dma.done.wait [#allocation3], 32  }
 0x173   :  { %1767 = vsyncadd [#allocation3], 4294967264 }
 0x174   :  { %1205 = vsyncpa [#allocation3], 1 }

</bundles_post_ra>
